<compile_context>
chip_gen: v6e
topology: v6e:2x2x1
jax: 0.10.0
libtpu: 0.0.40
codegen_flags: <defaults>
</compile_context>

<pallas_src>
import functools

import jax
import jax.numpy as jnp
from jax.experimental import pallas as pl
from jax.experimental.pallas import tpu as pltpu


def _cdiv(a, b):
    return -(-a // b)


def _rup(v, m):
    return _cdiv(v, m) * m


def _omni_attention_kernel(
    x_ref,       # (TB, TCin, THW)  input dtype (f32/bf16), streamed
    fcw_ref,     # (TCin, A)        fc weight chunk; BN scale & 1/(H*W) folded
    bnb_ref,     # (1, A)           BN shift
    wsig_ref,    # (A, Nsig)        fused channel|filter|spatial head, 1/T folded
    bsig_ref,    # (1, Nsig)
    wk_ref,      # (A, K)           kernel head, 1/T folded
    bk_ref,      # (1, K)
    sig_out,     # (TB, Nsig)
    kn_out,      # (TB, K)
    pool_acc,    # (TB, TCin) f32 scratch: spatial sum of the current cin chunk
    h_acc,       # (TB, A)    f32 scratch: running fc output across cin chunks
    *,
    hw_total,    # true H*W (python int)
    thw,         # spatial chunk size (python int)
    mask_tail,   # python bool: HW % THW != 0
):
    c = pl.program_id(1)
    hw = pl.program_id(2)
    nc = pl.num_programs(1)
    nhw = pl.num_programs(2)
    last_hw = hw == nhw - 1

    @pl.when(jnp.logical_and(c == 0, hw == 0))
    def _():
        h_acc[...] = jnp.zeros_like(h_acc)

    @pl.when(hw == 0)
    def _():
        pool_acc[...] = jnp.zeros_like(pool_acc)

    # Streamed partial spatial sum (AdaptiveAvgPool2d numerator); upcast to f32.
    xb = x_ref[...].astype(jnp.float32)
    if mask_tail:
        lane = jax.lax.broadcasted_iota(jnp.int32, xb.shape, 2)
        xb = jnp.where(hw * thw + lane < hw_total, xb, 0.0)
    pool_acc[...] += jnp.sum(xb, axis=-1)

    # Contract this cin chunk into the hidden activation (1/(H*W) and the BN
    # scale are already folded into fcw).
    @pl.when(last_hw)
    def _():
        h_acc[...] += jnp.dot(pool_acc[...], fcw_ref[...],
                              preferred_element_type=jnp.float32)

    # Epilogue: BN shift + ReLU, fused sigmoid heads, softmax kernel head.
    @pl.when(jnp.logical_and(last_hw, c == nc - 1))
    def _():
        h = jnp.maximum(h_acc[...] + bnb_ref[...], 0.0)                 # (TB, A)
        sig_out[...] = jax.nn.sigmoid(
            jnp.dot(h, wsig_ref[...], preferred_element_type=jnp.float32)
            + bsig_ref[...])
        kz = jnp.dot(h, wk_ref[...], preferred_element_type=jnp.float32) + bk_ref[...]
        kz = kz - jnp.max(kz, axis=-1, keepdims=True)
        e = jnp.exp(kz)
        kn_out[...] = e / jnp.sum(e, axis=-1, keepdims=True)


def _pick_tiles(B, Cin, HW, xbytes, budget, batch_tile):
    """Pick (TB, TCin, THW) so one x block fits `budget` bytes, TB stays
    sublane-dense, and >= 2 batch tiles exist for B >= 16 (megacore sharding)."""
    # --- batch tile ----------------------------------------------------------
    if B <= 8:
        TB = B                                       # exact blocks, no tail
    else:
        TB = min(int(batch_tile), _rup(B, 8))
        if B >= 16:
            TB = min(TB, _rup(_cdiv(B, 2), 8))       # >= 2 tiles -> both v7x TCs
        TB = max(8, TB)

    thw_min = min(HW, 128)                           # 128-lane chunk floor

    # --- channel chunk: divisor of Cin (multiple of 8, or Cin itself) --------
    cands = sorted({Cin, *[d for d in range(8, Cin, 8) if Cin % d == 0]})
    TCin = Cin
    if TB * Cin * thw_min * xbytes > budget:
        fitting = [d for d in cands if TB * d * thw_min * xbytes <= budget]
        if fitting:
            TCin = max(fitting)
        else:
            TCin = cands[0]                          # smallest chunk; shrink TB
            if B > 8:
                fit_tb = (budget // max(TCin * thw_min * xbytes, 1)) // 8 * 8
                TB = max(8, min(TB, int(fit_tb)))

    # --- spatial chunk --------------------------------------------------------
    if HW <= 128:
        THW = HW
    else:
        max_thw = budget // max(TB * TCin * xbytes, 1)
        THW = max(128, (max_thw // 128) * 128)
        if THW >= HW:
            THW = HW
    return TB, TCin, THW


def omni_attention_forward(x_nchw, params, kernel_size, kernel_num,
                           temperature=1.0, batch_tile=256, x_block_bytes=None):
    """x_nchw: (B, Cin, H, W) float32 or bfloat16. Returns the 4 attention
    tensors with the same shapes PyTorch produces."""
    B, Cin, H, W = x_nchw.shape
    HW = H * W
    fcw, bns, bnb, chw, chb, fw, fb, spw, spb, knw, knb = params
    A = fcw.shape[0]
    Cout = fw.shape[0]
    KK = kernel_size * kernel_size
    K = kernel_num
    Nsig = Cin + Cout + KK
    f32 = jnp.float32

    # ---- host-side weight prep: transpose + fold BN scale, 1/(H*W), 1/T -----
    inv_t = 1.0 / float(temperature)
    inv_hw = 1.0 / float(HW)
    fcw_s = (fcw.T.astype(f32) * bns.astype(f32)) * inv_hw          # (Cin, A)
    bnb_s = bnb.astype(f32)                                         # (1, A)
    wsig = jnp.concatenate([chw, fw, spw], axis=0).T.astype(f32) * inv_t   # (A, Nsig)
    bsig = jnp.concatenate([chb, fb, spb], axis=1).astype(f32) * inv_t     # (1, Nsig)
    wk = knw.T.astype(f32) * inv_t                                  # (A, K)
    bk = knb.astype(f32) * inv_t                                    # (1, K)

    # ---- generation-aware budgets -------------------------------------------
    try:
        vmem_cap = int(pltpu.get_tpu_info().vmem_capacity_bytes)
    except Exception:
        vmem_cap = 64 << 20                                         # conservative (v7x)
    if x_block_bytes is None:
        x_block_bytes = max(1 << 20,
                            vmem_cap // (16 if vmem_cap <= (64 << 20) else 12))

    xbytes = jnp.dtype(x_nchw.dtype).itemsize
    TB, TCin, THW = _pick_tiles(B, Cin, HW, xbytes, int(x_block_bytes), int(batch_tile))
    nb, ncin, nhw = _cdiv(B, TB), _cdiv(Cin, TCin), _cdiv(HW, THW)
    mask_tail = (HW % THW) != 0

    # No pad, no dtype cast: reshape of contiguous trailing dims is free.
    x_flat = x_nchw.reshape(B, Cin, HW)

    # ---- explicit VMEM ask (double-buffered blocks + scratch, no over-doubling)
    x_buf = TB * _rup(TCin, 8) * _rup(THW, 128) * xbytes
    fcw_buf = _rup(TCin, 8) * _rup(A, 128) * 4
    const_buf = (_rup(1, 8) * _rup(A, 128) + _rup(A, 8) * _rup(Nsig, 128)
                 + _rup(1, 8) * _rup(Nsig, 128) + _rup(A, 8) * _rup(K, 128)
                 + _rup(1, 8) * _rup(K, 128)) * 4
    out_buf = _rup(TB, 8) * (_rup(Nsig, 128) + _rup(K, 128)) * 4
    scr_buf = _rup(TB, 8) * (_rup(TCin, 128) + _rup(A, 128)) * 4
    vmem_est = 2 * (x_buf + fcw_buf + const_buf + out_buf) + scr_buf
    vmem_limit = min(max(vmem_est + (4 << 20), 16 << 20), vmem_cap // 2)
    if vmem_est + (1 << 20) > vmem_limit:            # degenerate case: ask what we need
        vmem_limit = min(vmem_est + (2 << 20), int(vmem_cap * 0.9))
    vmem_limit = int(vmem_limit)

    kernel = functools.partial(_omni_attention_kernel,
                               hw_total=HW, thw=THW, mask_tail=mask_tail)

    sig, kn = pl.pallas_call(
        kernel,
        out_shape=(
            jax.ShapeDtypeStruct((B, Nsig), f32),
            jax.ShapeDtypeStruct((B, K), f32),
        ),
        grid_spec=pltpu.PrefetchScalarGridSpec(
            num_scalar_prefetch=0,
            grid=(nb, ncin, nhw),                    # batch | cin chunks | hw chunks
            in_specs=[
                pl.BlockSpec((TB, TCin, THW), lambda b, c, hw: (b, c, hw)),
                pl.BlockSpec((TCin, A), lambda b, c, hw: (c, 0)),
                pl.BlockSpec((1, A), lambda b, c, hw: (0, 0)),
                pl.BlockSpec((A, Nsig), lambda b, c, hw: (0, 0)),
                pl.BlockSpec((1, Nsig), lambda b, c, hw: (0, 0)),
                pl.BlockSpec((A, K), lambda b, c, hw: (0, 0)),
                pl.BlockSpec((1, K), lambda b, c, hw: (0, 0)),
            ],
            out_specs=[
                pl.BlockSpec((TB, Nsig), lambda b, c, hw: (b, 0)),
                pl.BlockSpec((TB, K), lambda b, c, hw: (b, 0)),
            ],
            scratch_shapes=[
                pltpu.VMEM((TB, TCin), f32),
                pltpu.VMEM((TB, A), f32),
            ],
        ),
        compiler_params=pltpu.CompilerParams(
            dimension_semantics=("parallel", "arbitrary", "arbitrary"),
            vmem_limit_bytes=vmem_limit,
        ),
    )(x_flat, fcw_s, bnb_s, wsig, bsig, wk, bk)

    channel_attention = sig[:, :Cin].reshape(B, Cin, 1, 1)
    filter_attention = sig[:, Cin:Cin + Cout].reshape(B, Cout, 1, 1)
    spatial_attention = sig[:, Cin + Cout:].reshape(B, 1, 1, 1, kernel_size, kernel_size)
    kernel_attention = kn.reshape(B, K, 1, 1, 1, 1)
    return channel_attention, filter_attention, spatial_attention, kernel_attention


def make_params(key, in_planes, out_planes, kernel_size, kernel_num,
                reduction=0.0625, min_channel=16):
    """Deterministic synthetic parameters matching the PyTorch __init__ shapes.
    Conv weights ~ kaiming_normal(fan_out, relu); biases = 0; BN gamma=1, beta=0,
    eval-mode with running stats (0, 1)."""
    A = max(int(in_planes * reduction), min_channel)
    KK = kernel_size * kernel_size
    ks = jax.random.split(key, 5)

    def kaiming(k, out_c, in_c):
        std = (2.0 / out_c) ** 0.5          # fan_out of a 1x1 conv = out_channels
        return std * jax.random.normal(k, (out_c, in_c), jnp.float32)

    fcw = kaiming(ks[0], A, in_planes)
    eps = 1e-5
    bn_scale = jnp.full((1, A), 1.0 / jnp.sqrt(1.0 + eps), jnp.float32)  # gamma/sqrt(var+eps)
    bn_shift = jnp.zeros((1, A), jnp.float32)                            # beta - mean*scale
    chw = kaiming(ks[1], in_planes, A)
    chb = jnp.zeros((1, in_planes), jnp.float32)
    fw = kaiming(ks[2], out_planes, A)
    fb = jnp.zeros((1, out_planes), jnp.float32)
    spw = kaiming(ks[3], KK, A)
    spb = jnp.zeros((1, KK), jnp.float32)
    knw = kaiming(ks[4], kernel_num, A)
    knb = jnp.zeros((1, kernel_num), jnp.float32)
    return (fcw, bn_scale, bn_shift, chw, chb, fw, fb, spw, spb, knw, knb)


def _reference(x_nchw, params, kernel_size, kernel_num, temperature=1.0):
    """Pure-JAX reference of the same forward, for correctness checks."""
    fcw, bns, bnb, chw, chb, fw, fb, spw, spb, knw, knb = params
    B, Cin, H, W = x_nchw.shape
    pooled = jnp.mean(x_nchw, axis=(2, 3))                        # (B, Cin)
    h = jnp.maximum(pooled @ fcw.T * bns + bnb, 0.0)              # (B, A)
    ch = jax.nn.sigmoid((h @ chw.T + chb) / temperature)
    fl = jax.nn.sigmoid((h @ fw.T + fb) / temperature)
    sp = jax.nn.sigmoid((h @ spw.T + spb) / temperature)
    kn = jax.nn.softmax((h @ knw.T + knb) / temperature, axis=-1)
    return (ch.reshape(B, Cin, 1, 1), fl.reshape(B, -1, 1, 1),
            sp.reshape(B, 1, 1, 1, kernel_size, kernel_size),
            kn.reshape(B, kernel_num, 1, 1, 1, 1))


if __name__ == "__main__":
    key = jax.random.PRNGKey(0)

    # ---- test 1: small config consistent with module defaults (single block) -
    B, Cin, H, W = 2, 4, 16, 16
    out_planes, kernel_size, kernel_num = 4, 3, 4
    kx, kp, key = jax.random.split(key, 3)
    x = jax.random.normal(kx, (B, Cin, H, W), jnp.float32)
    params = make_params(kp, Cin, out_planes, kernel_size, kernel_num)
    outs = jax.block_until_ready(
        omni_attention_forward(x, params, kernel_size, kernel_num, temperature=1.0))
    refs = _reference(x, params, kernel_size, kernel_num, temperature=1.0)
    for o, r in zip(outs, refs):
        assert o.shape == r.shape
        assert bool(jnp.allclose(o, r, atol=1e-5, rtol=1e-5)), "test1 mismatch"

    # ---- test 2: cin chunking + spatial streaming with a ragged HW tail, T=2 -
    B2, Cin2, H2, W2 = 5, 16, 18, 18            # HW=324 -> 3 chunks of 128, masked tail
    out_planes2, kernel_size2, kernel_num2 = 24, 3, 4
    kx2, kp2, key = jax.random.split(key, 3)
    x2 = jax.random.normal(kx2, (B2, Cin2, H2, W2), jnp.float32)
    params2 = make_params(kp2, Cin2, out_planes2, kernel_size2, kernel_num2)
    outs2 = jax.block_until_ready(
        omni_attention_forward(x2, params2, kernel_size2, kernel_num2,
                               temperature=2.0, x_block_bytes=4096))  # force tiny blocks
    refs2 = _reference(x2, params2, kernel_size2, kernel_num2, temperature=2.0)
    for o, r in zip(outs2, refs2):
        assert o.shape == r.shape
        assert bool(jnp.allclose(o, r, atol=1e-5, rtol=1e-5)), "test2 mismatch"

    # ---- test 3: bf16 x streamed without host upcast -------------------------
    x3 = x.astype(jnp.bfloat16)
    outs3 = jax.block_until_ready(
        omni_attention_forward(x3, params, kernel_size, kernel_num, temperature=1.0))
    refs3 = _reference(x3.astype(jnp.float32), params, kernel_size, kernel_num)
    for o, r in zip(outs3, refs3):
        assert o.shape == r.shape
        assert bool(jnp.allclose(o, r, atol=1e-4, rtol=1e-4)), "test3 mismatch"

    print("KERNEL_OK")
</pallas_src>

<mosaic_0001>
module attributes {stable_mosaic.version = 11 : i64} {
  func.func @_omni_attention_kernel(%arg0: i32, %arg1: i32, %arg2: i32, %arg3: memref<2x4x256xf32, #tpu.memory_space<vmem>>, %arg4: memref<4x16xf32, #tpu.memory_space<vmem>>, %arg5: memref<1x16xf32, #tpu.memory_space<vmem>>, %arg6: memref<16x17xf32, #tpu.memory_space<vmem>>, %arg7: memref<1x17xf32, #tpu.memory_space<vmem>>, %arg8: memref<16x4xf32, #tpu.memory_space<vmem>>, %arg9: memref<1x4xf32, #tpu.memory_space<vmem>>, %arg10: memref<2x17xf32, #tpu.memory_space<vmem>>, %arg11: memref<2x4xf32, #tpu.memory_space<vmem>>, %arg12: memref<2x4xf32, #tpu.memory_space<vmem>>, %arg13: memref<2x16xf32, #tpu.memory_space<vmem>>) attributes {dimension_semantics = [#tpu.dimension_semantics<parallel>, #tpu.dimension_semantics<arbitrary>, #tpu.dimension_semantics<arbitrary>], iteration_bounds = array<i64: 1, 1, 1>, scalar_prefetch = 0 : i64, scratch_operands = 2 : i64, tpu.core_type = #tpu.core_type<tc>, window_params = [{transform_indices = @transform_0, window_bounds = array<i64: 2, 4, 256>}, {transform_indices = @transform_1, window_bounds = array<i64: 4, 16>}, {pipeline_mode = #tpu.pipeline_mode<synchronous>, transform_indices = @transform_2, window_bounds = array<i64: 1, 16>}, {pipeline_mode = #tpu.pipeline_mode<synchronous>, transform_indices = @transform_3, window_bounds = array<i64: 16, 17>}, {pipeline_mode = #tpu.pipeline_mode<synchronous>, transform_indices = @transform_4, window_bounds = array<i64: 1, 17>}, {pipeline_mode = #tpu.pipeline_mode<synchronous>, transform_indices = @transform_5, window_bounds = array<i64: 16, 4>}, {pipeline_mode = #tpu.pipeline_mode<synchronous>, transform_indices = @transform_6, window_bounds = array<i64: 1, 4>}, {transform_indices = @transform_7, window_bounds = array<i64: 2, 17>}, {transform_indices = @transform_8, window_bounds = array<i64: 2, 4>}]} {
    %c0_i32 = arith.constant 0 : i32
    %0 = arith.cmpi eq, %arg2, %c0_i32 : i32
    %c0_i32_0 = arith.constant 0 : i32
    %1 = arith.cmpi eq, %arg1, %c0_i32_0 : i32
    %c0_i32_1 = arith.constant 0 : i32
    %2 = arith.cmpi eq, %arg2, %c0_i32_1 : i32
    %3 = arith.andi %1, %2 : i1
    %4 = arith.extui %3 : i1 to i32
    %c0_i32_2 = arith.constant 0 : i32
    %5 = arith.cmpi ne, %4, %c0_i32_2 : i32
    scf.if %5 {
      %cst_14 = arith.constant 0.000000e+00 : f32
      %20 = vector.broadcast %cst_14 : f32 to vector<2x16xf32>
      %c0_15 = arith.constant 0 : index
      %c0_16 = arith.constant 0 : index
      %21 = vector.load %arg13[%c0_15, %c0_16] : memref<2x16xf32, #tpu.memory_space<vmem>>, vector<2x16xf32>
      tpu.vector_store %arg13[%c0_15, %c0_16], %20 {strides = array<i32>} : memref<2x16xf32, #tpu.memory_space<vmem>>, vector<2x16xf32>,
    } else {
    }
    %c0_i32_3 = arith.constant 0 : i32
    %6 = arith.cmpi eq, %arg2, %c0_i32_3 : i32
    %7 = arith.extui %6 : i1 to i32
    %c0_i32_4 = arith.constant 0 : i32
    %8 = arith.cmpi ne, %7, %c0_i32_4 : i32
    scf.if %8 {
      %cst_14 = arith.constant 0.000000e+00 : f32
      %20 = vector.broadcast %cst_14 : f32 to vector<2x4xf32>
      %c0_15 = arith.constant 0 : index
      %c0_16 = arith.constant 0 : index
      %21 = vector.load %arg12[%c0_15, %c0_16] : memref<2x4xf32, #tpu.memory_space<vmem>>, vector<2x4xf32>
      tpu.vector_store %arg12[%c0_15, %c0_16], %20 {strides = array<i32>} : memref<2x4xf32, #tpu.memory_space<vmem>>, vector<2x4xf32>,
    } else {
    }
    %c0 = arith.constant 0 : index
    %c0_5 = arith.constant 0 : index
    %c0_6 = arith.constant 0 : index
    %9 = vector.load %arg3[%c0, %c0_5, %c0_6] : memref<2x4x256xf32, #tpu.memory_space<vmem>>, vector<2x4x256xf32>
    %c0_7 = arith.constant 0 : index
    %c0_8 = arith.constant 0 : index
    %10 = vector.load %arg12[%c0_7, %c0_8] : memref<2x4xf32, #tpu.memory_space<vmem>>, vector<2x4xf32>
    %cst = arith.constant dense<0.000000e+00> : vector<2x4xf32>
    %11 = vector.multi_reduction <add>, %9, %cst [2] : vector<2x4x256xf32> to vector<2x4xf32>
    %12 = arith.addf %10, %11 : vector<2x4xf32>
    %c0_9 = arith.constant 0 : index
    %c0_10 = arith.constant 0 : index
    %13 = vector.load %arg12[%c0_9, %c0_10] : memref<2x4xf32, #tpu.memory_space<vmem>>, vector<2x4xf32>
    tpu.vector_store %arg12[%c0_9, %c0_10], %12 {strides = array<i32>} : memref<2x4xf32, #tpu.memory_space<vmem>>, vector<2x4xf32>,
    %14 = arith.extui %0 : i1 to i32
    %c0_i32_11 = arith.constant 0 : i32
    %15 = arith.cmpi ne, %14, %c0_i32_11 : i32
    scf.if %15 {
      %c0_14 = arith.constant 0 : index
      %c0_15 = arith.constant 0 : index
      %20 = vector.load %arg13[%c0_14, %c0_15] : memref<2x16xf32, #tpu.memory_space<vmem>>, vector<2x16xf32>
      %c0_16 = arith.constant 0 : index
      %c0_17 = arith.constant 0 : index
      %21 = vector.load %arg12[%c0_16, %c0_17] : memref<2x4xf32, #tpu.memory_space<vmem>>, vector<2x4xf32>
      %c0_18 = arith.constant 0 : index
      %c0_19 = arith.constant 0 : index
      %22 = vector.load %arg4[%c0_18, %c0_19] : memref<4x16xf32, #tpu.memory_space<vmem>>, vector<4x16xf32>
      %cst_20 = arith.constant dense<0.000000e+00> : vector<2x16xf32>
      %23 = tpu.matmul %21, %22, %cst_20 {dimension_numbers = #tpu.dot_dimension_numbers<[1], [0], [0], [1], [0, 0, 1, 1], [], []>} : vector<2x4xf32>, vector<4x16xf32>, vector<2x16xf32> -> vector<2x16xf32>
      %24 = arith.addf %20, %23 : vector<2x16xf32>
      %c0_21 = arith.constant 0 : index
      %c0_22 = arith.constant 0 : index
      %25 = vector.load %arg13[%c0_21, %c0_22] : memref<2x16xf32, #tpu.memory_space<vmem>>, vector<2x16xf32>
      tpu.vector_store %arg13[%c0_21, %c0_22], %24 {strides = array<i32>} : memref<2x16xf32, #tpu.memory_space<vmem>>, vector<2x16xf32>,
    } else {
    }
    %c0_i32_12 = arith.constant 0 : i32
    %16 = arith.cmpi eq, %arg1, %c0_i32_12 : i32
    %17 = arith.andi %0, %16 : i1
    %18 = arith.extui %17 : i1 to i32
    %c0_i32_13 = arith.constant 0 : i32
    %19 = arith.cmpi ne, %18, %c0_i32_13 : i32
    scf.if %19 {
      %c0_14 = arith.constant 0 : index
      %c0_15 = arith.constant 0 : index
      %20 = vector.load %arg13[%c0_14, %c0_15] : memref<2x16xf32, #tpu.memory_space<vmem>>, vector<2x16xf32>
      %c0_16 = arith.constant 0 : index
      %c0_17 = arith.constant 0 : index
      %21 = vector.load %arg5[%c0_16, %c0_17] : memref<1x16xf32, #tpu.memory_space<vmem>>, vector<1x16xf32>
      %22 = vector.broadcast %21 : vector<1x16xf32> to vector<2x16xf32>
      %23 = arith.addf %20, %22 : vector<2x16xf32>
      %cst_18 = arith.constant 0.000000e+00 : f32
      %24 = vector.broadcast %cst_18 : f32 to vector<2x16xf32>
      %25 = arith.maximumf %23, %24 : vector<2x16xf32>
      %c0_19 = arith.constant 0 : index
      %c0_20 = arith.constant 0 : index
      %26 = vector.load %arg6[%c0_19, %c0_20] : memref<16x17xf32, #tpu.memory_space<vmem>>, vector<16x17xf32>
      %cst_21 = arith.constant dense<0.000000e+00> : vector<2x17xf32>
      %27 = tpu.matmul %25, %26, %cst_21 {dimension_numbers = #tpu.dot_dimension_numbers<[1], [0], [0], [1], [0, 0, 1, 1], [], []>} : vector<2x16xf32>, vector<16x17xf32>, vector<2x17xf32> -> vector<2x17xf32>
      %c0_22 = arith.constant 0 : index
      %c0_23 = arith.constant 0 : index
      %28 = vector.load %arg7[%c0_22, %c0_23] : memref<1x17xf32, #tpu.memory_space<vmem>>, vector<1x17xf32>
      %29 = vector.broadcast %28 : vector<1x17xf32> to vector<2x17xf32>
      %30 = arith.addf %27, %29 : vector<2x17xf32>
      %31 = arith.negf %30 : vector<2x17xf32>
      %32 = math.exp %31 : vector<2x17xf32>
      %cst_24 = arith.constant 1.000000e+00 : f32
      %33 = vector.broadcast %cst_24 : f32 to vector<2x17xf32>
      %34 = arith.addf %33, %32 : vector<2x17xf32>
      %35 = arith.divf %33, %34 : vector<2x17xf32>
      %c0_25 = arith.constant 0 : index
      %c0_26 = arith.constant 0 : index
      %36 = vector.load %arg10[%c0_25, %c0_26] : memref<2x17xf32, #tpu.memory_space<vmem>>, vector<2x17xf32>
      tpu.vector_store %arg10[%c0_25, %c0_26], %35 {strides = array<i32>} : memref<2x17xf32, #tpu.memory_space<vmem>>, vector<2x17xf32>,
      %c0_27 = arith.constant 0 : index
      %c0_28 = arith.constant 0 : index
      %37 = vector.load %arg8[%c0_27, %c0_28] : memref<16x4xf32, #tpu.memory_space<vmem>>, vector<16x4xf32>
      %cst_29 = arith.constant dense<0.000000e+00> : vector<2x4xf32>
      %38 = tpu.matmul %25, %37, %cst_29 {dimension_numbers = #tpu.dot_dimension_numbers<[1], [0], [0], [1], [0, 0, 1, 1], [], []>} : vector<2x16xf32>, vector<16x4xf32>, vector<2x4xf32> -> vector<2x4xf32>
      %c0_30 = arith.constant 0 : index
      %c0_31 = arith.constant 0 : index
      %39 = vector.load %arg9[%c0_30, %c0_31] : memref<1x4xf32, #tpu.memory_space<vmem>>, vector<1x4xf32>
      %40 = vector.broadcast %39 : vector<1x4xf32> to vector<2x4xf32>
      %41 = arith.addf %38, %40 : vector<2x4xf32>
      %cst_32 = arith.constant dense<0xFF800000> : vector<2xf32>
      %42 = vector.multi_reduction <maximumf>, %41, %cst_32 [1] : vector<2x4xf32> to vector<2xf32>
      %43 = vector.shape_cast %42 : vector<2xf32> to vector<2x1xf32>
      %44 = vector.broadcast %43 : vector<2x1xf32> to vector<2x4xf32>
      %45 = arith.subf %41, %44 : vector<2x4xf32>
      %46 = math.exp %45 : vector<2x4xf32>
      %cst_33 = arith.constant dense<0.000000e+00> : vector<2xf32>
      %47 = vector.multi_reduction <add>, %46, %cst_33 [1] : vector<2x4xf32> to vector<2xf32>
      %48 = vector.shape_cast %47 : vector<2xf32> to vector<2x1xf32>
      %49 = vector.broadcast %48 : vector<2x1xf32> to vector<2x4xf32>
      %50 = arith.divf %46, %49 : vector<2x4xf32>
      %c0_34 = arith.constant 0 : index
      %c0_35 = arith.constant 0 : index
      %51 = vector.load %arg11[%c0_34, %c0_35] : memref<2x4xf32, #tpu.memory_space<vmem>>, vector<2x4xf32>
      tpu.vector_store %arg11[%c0_34, %c0_35], %50 {strides = array<i32>} : memref<2x4xf32, #tpu.memory_space<vmem>>, vector<2x4xf32>,
    } else {
    }
    return
  }
  func.func @transform_0(%arg0: i32, %arg1: i32, %arg2: i32) -> (i32, i32, i32) {
    %c0_i32 = arith.constant 0 : i32
    return %arg0, %arg1, %arg2 : i32, i32, i32
  }
  func.func @transform_1(%arg0: i32, %arg1: i32, %arg2: i32) -> (i32, i32) {
    %c0_i32 = arith.constant 0 : i32
    %c0_i32_0 = arith.constant 0 : i32
    return %arg1, %c0_i32 : i32, i32
  }
  func.func @transform_2(%arg0: i32, %arg1: i32, %arg2: i32) -> (i32, i32) {
    %c0_i32 = arith.constant 0 : i32
    %c0_i32_0 = arith.constant 0 : i32
    %c0_i32_1 = arith.constant 0 : i32
    return %c0_i32, %c0_i32_0 : i32, i32
  }
  func.func @transform_3(%arg0: i32, %arg1: i32, %arg2: i32) -> (i32, i32) {
    %c0_i32 = arith.constant 0 : i32
    %c0_i32_0 = arith.constant 0 : i32
    %c0_i32_1 = arith.constant 0 : i32
    return %c0_i32, %c0_i32_0 : i32, i32
  }
  func.func @transform_4(%arg0: i32, %arg1: i32, %arg2: i32) -> (i32, i32) {
    %c0_i32 = arith.constant 0 : i32
    %c0_i32_0 = arith.constant 0 : i32
    %c0_i32_1 = arith.constant 0 : i32
    return %c0_i32, %c0_i32_0 : i32, i32
  }
  func.func @transform_5(%arg0: i32, %arg1: i32, %arg2: i32) -> (i32, i32) {
    %c0_i32 = arith.constant 0 : i32
    %c0_i32_0 = arith.constant 0 : i32
    %c0_i32_1 = arith.constant 0 : i32
    return %c0_i32, %c0_i32_0 : i32, i32
  }
  func.func @transform_6(%arg0: i32, %arg1: i32, %arg2: i32) -> (i32, i32) {
    %c0_i32 = arith.constant 0 : i32
    %c0_i32_0 = arith.constant 0 : i32
    %c0_i32_1 = arith.constant 0 : i32
    return %c0_i32, %c0_i32_0 : i32, i32
  }
  func.func @transform_7(%arg0: i32, %arg1: i32, %arg2: i32) -> (i32, i32) {
    %c0_i32 = arith.constant 0 : i32
    %c0_i32_0 = arith.constant 0 : i32
    return %arg0, %c0_i32 : i32, i32
  }
  func.func @transform_8(%arg0: i32, %arg1: i32, %arg2: i32) -> (i32, i32) {
    %c0_i32 = arith.constant 0 : i32
    %c0_i32_0 = arith.constant 0 : i32
    return %arg0, %c0_i32 : i32, i32
  }
}

</mosaic_0001>

<bundles_post_ra>
// kernel: tpu_custom_call.1
= control target key start
LH: loop header
LB: loop body
LE: loop exit
PB: predicated region body
PF: predicated region fallthrough
CT: control target
= control target key end

     0   :  { %14 = vsyncpa [#allocation5], 0  ;;  %s622_s0 = inlined_call_operand.vmem [shape: f32[2,4,256], index: 0, kind: input, shape index: {}]   ;;  %s623_s1 = inlined_call_operand.vmem [shape: f32[4,16], index: 1, kind: input, shape index: {}]   ;;  %s624_s2 = inlined_call_operand.vmem [shape: f32[1,16], index: 2, kind: input, shape index: {}]   ;;  %s625_s3 = inlined_call_operand.hbm [shape: f32[16,17], index: 3, kind: input, shape index: {}]   ;;  %s626_s4 = inlined_call_operand.vmem [shape: f32[1,17], index: 4, kind: input, shape index: {}]   ;;  %s627_s5 = inlined_call_operand.vmem [shape: f32[16,4], index: 5, kind: input, shape index: {}]   ;;  %s628_s6 = inlined_call_operand.vmem [shape: f32[1,4], index: 6, kind: input, shape index: {}]   ;;  %s629_s7 = inlined_call_operand.hbm [shape: f32[2,17], index: 7, kind: output, shape index: {0}]   ;;  %s630_s8 = inlined_call_operand.hbm [shape: f32[2,4], index: 8, kind: output, shape index: {1}]  }
   0x1   :  { %15 = vsyncpa [#allocation6], 0 }
   0x2   :  { %16 = vsyncpa [#allocation9], 0  ;;  %s522_s27 = smov [#allocation4]  }
   0x3   :  { %s28_s28 = sshll.u32 %s522_s27, 4  ;;  %s29_s28 = int_to_ptr.vmem [resolvable:$true] %s28_s28 }
   0x4   :  { %s464_s29 = scalar_lea.vmem %s29_s28, 256  ;;  %p469_p1 = scmp.lt.s32.totalorder %s29_s28, %s29_s28 }
   0x5   :  { %p465_p0 = scmp.ne.s32.totalorder %s29_s28, %s464_s29  ;;  %p470_p2 = scmp.lt.s32.totalorder %s464_s29, %s464_s29 }
   0x7   :  { %p471_p3 = por %p470_p2, %p469_p1 }
   0x9   :  { %p472_p4 = pnand %p471_p3, %p465_p0 }
   0xb   :  { %475 = shalt.err (!%p472_p4)
}
   0xc   :  { %s523_s30 = smov 128   ;;  %s524_s9 = smov 8  }
   0xd   :  { %34 = dma.hbm_to_vmem [thread:$0]  %s625_s3, 256, %s29_s28, [#allocation5], %s523_s30, %s523_s30, %s524_s9  }
   0xe   :  { %516 = dma.done.wait [#allocation5], 256  }
   0xf   :  { %517 = vsyncadd [#allocation5], 4294967040  ;;  %vm66_vm0 = vcmask 1043456   ;;  %v57_v0 = vld [vmem:[%s622_s0] sm:$0xff]  ;;  %v58_v1 = vld [vmem:[%s622_s0 + $0x8] sm:$0xff]  ;;  %vm55_vm1 = vcmask 25600   ;;  %v79_v12 = vlaneseq }
  0x10   :  { %v62_v2 = vcombine.high %v57_v0, %v57_v0  ;;  %v67_v3 = vsel %vm66_vm0, %v57_v0, 0.0  ;;  %v63_v4 = vcombine.high %v58_v1, %v58_v1  ;;  %v72_v6 = vsel %vm66_vm0, %v58_v1, 0.0  ;;  %v100_v11 = vld [vmem:[%s623_s1] sm:$0xf]  ;;  %v285_v24 = vld [vmem:[%s627_s5 + $0x8] sm:$0xff] }
  0x11   :  { %v525_v10 = vmov 0.0   ;;  %vm526_vm2 = vmmov 0   ;;  %vm50_vm3 = vcmask 123904   ;;  %v80_v13 = vand.u32 127, %v79_v12  ;;  %v194_v25 = vld [vmem:[#allocation4 + $0x8] sm:$0xff]  ;;  %v284_v26 = vld [vmem:[%s627_s5] sm:$0xff] }
  0x12   :  { %v68_v5 = vsel %vm66_vm0, %v62_v2, 0.0  ;;  %v73_v7 = vsel %vm66_vm0, %v63_v4, 0.0  ;;  %56 = vst.msk [vmem:[#allocation2] sm:$0x3] %vm55_vm1, %v525_v10  ;;  %420 = vmatprep.subr.mxu0 %v525_v10  ;;  %425 = vmatprep.subr.mxu1 %v525_v10  ;;  %v82_v14 = vshrl.u32 %v79_v12, 7  ;;  %vm89_vm4 = vcmask 1041409  }
  0x13   :  { %v69_v8 = vadd.f32 %v68_v5, %v67_v3  ;;  %v74_v9 = vadd.f32 %v73_v7, %v72_v6  ;;  %421 = vmatpush3.msk.msra.mxu0 %vm66_vm0, %v100_v11  ;;  %422 = vmatprep.mubr.msk.f32.mxu0 %vm526_vm2, %v525_v10  ;;  %51 = vst.msk [vmem:[#allocation3] sm:$0x3] %vm50_vm3, %v525_v10  ;;  %vm101_vm5 = vcmask 31744   ;;  %v193_v27 = vld [vmem:[#allocation4] sm:$0xff]  ;;  %v406_v32 = vld [vmem:[%s624_s2] ss:$0 sm:$0xff] }
  0x14   :  { %432 = vmatprep.subr.mxu0 %v525_v10  ;;  %429 = vmatprep.mubr.msk.f32.mxu1 %vm526_vm2, %v525_v10  ;;  %v83_v16 = vsub.s32 %v80_v13, %v82_v14  ;;  %vm202_vm6 = vcmask 130048   ;;  %v407_v36 = vld [vmem:[%s626_s4] ss:$0 sm:$0xff]  ;;  %vm282_vm7 = vcmask 132096   ;;  %s527_s2 = smov [#allocation7]  }
  0x15   :  { %70 = vadd.xlane.f32.xlu0 %v69_v8  ;;  %426 = vmatpush3.msra.mxu1 %v194_v25  ;;  %v410_v37 = vld [vmem:[%s628_s6] ss:$0 sm:$0xff]  ;;  %s381_s4 = sshll.u32 %s527_s2, 4  ;;  %s382_s4 = int_to_ptr.vmem [resolvable:$true] %s381_s4 }
  0x16   :  { %427 = vmatprep.subr.mxu1 %v525_v10  ;;  %s476_s6 = scalar_lea.vmem %s382_s4, 32  ;;  %p481_p6 = scmp.lt.s32.totalorder %s382_s4, %s382_s4 }
  0x17   :  { %428 = vmatpush3.msra.mxu1 %v193_v27  ;;  %p477_p5 = scmp.ne.s32.totalorder %s382_s4, %s476_s6  ;;  %p482_p7 = scmp.lt.s32.totalorder %s476_s6, %s476_s6 }
  0x19   :  { %75 = vadd.xlane.f32.xlu0 %v74_v9  ;;  %v59_v19 = vld [vmem:[#allocation2] sm:$0x3]  ;;  %p483_p8 = por %p482_p7, %p481_p6 }
  0x1a   :  { %v98_v28 = vld [vmem:[#allocation3] sm:$0x3] }
  0x1b   :  { %p484_p9 = pnand %p483_p8, %p477_p5 }
  0x9e   :  { %v71_v15 = vpop.xlane.xlu0 %70 }
  0x9f   :  { %v84_v18 = vrot.slane %v71_v15, %v83_v16 }
  0xa2   :  { %v76_v17 = vpop.xlane.xlu0 %75 }
  0xa3   :  { %v88_v20 = vrot.slane %v76_v17, %v83_v16 }
  0xa5   :  { %v90_v21 = vsel %vm89_vm4, %v88_v20, %v84_v18 }
  0xa6   :  { %v92_v22 = vadd.f32 %v90_v21, %v59_v19 }
  0xa8   :  { %94 = vst.msk [vmem:[#allocation2] sm:$0x3] %vm55_vm1, %v92_v22 }
  0xaf   :  { %v99_v23 = vld [vmem:[#allocation2] sm:$0x3] }
  0xb0   :  { %423 = vmatmul.mubr.msk.f32.vlgmr.msra.gmra.mxu0 %vm101_vm5, %v99_v23 }
  0xb1   :  { %436 = vmatprep.mubr.msk.f32.mxu0 %vm526_vm2, %v525_v10  ;;  %433 = vmatpush3.msra.mxu0 %v285_v24 }
  0xb2   :  { %434 = vmatprep.subr.mxu0 %v525_v10 }
  0xb3   :  { %435 = vmatpush3.msra.mxu0 %v284_v26 }
 0x170   :  { %v174_v29 = vpop.f32.mrf.mxu0 }
 0x171   :  { %v178_v30 = vadd.f32 %v174_v29, %v98_v28 }
 0x172   :  { %v424_v31 = vpop.f32.mrf.mxu0 }
 0x173   :  { %180 = vst.msk [vmem:[#allocation3] sm:$0x3] %vm50_vm3, %v178_v30 }
 0x17a   :  { %v183_v33 = vld [vmem:[#allocation3] sm:$0x3] }
 0x17b   :  { %v191_v34 = vadd.f32 %v406_v32, %v183_v33 }
 0x17d   :  { %v192_v35 = vmax.f32 %v191_v34, 0.0 }
 0x17f   :  { %430 = vmatmul.mubr.msk.f32.vlgmr.msra.gmra.mxu1 %vm202_vm6, %v192_v35  ;;  %437 = vmatmul.mubr.msk.f32.vlgmr.msra.gmra.mxu0 %vm202_vm6, %v192_v35 }
 0x23f   :  { %v272_v38 = vpop.f32.mrf.mxu1  ;;  %v359_v39 = vpop.f32.mrf.mxu0 }
 0x240   :  { %v273_v40 = vadd.f32 %v407_v36, %v272_v38  ;;  %v360_v41 = vadd.f32 %v410_v37, %v359_v39 }
 0x241   :  { %v431_v42 = vpop.f32.mrf.mxu1  ;;  %v438_v43 = vpop.f32.mrf.mxu0 }
 0x242   :  { %v409_v44 = vmul.f32 -1.442695, %v273_v40  ;;  %v363_v45 = vsel %vm55_vm1, %v360_v41, -inf }
 0x243   :  { %364 = vmax.xlane.f32.xlu1 %v363_v45 }
 0x244   :  { %448 = vpow2.f32 %v409_v44 }
 0x251   :  { %v449_v46 = vpop.eup %448 }
 0x252   :  { %v279_v47 = vadd.f32 1.0, %v449_v46 }
 0x254   :  { %450 = vrcp.f32 %v279_v47 }
 0x261   :  { %v451_v48 = vpop.eup %450 }
 0x262   :  { %283 = vst.msk [vmem:[#allocation7] sm:$0x3] %vm282_vm7, %v451_v48 }
 0x2cc   :  { %v365_v49 = vpop.xlane.xlu1 %364 }
 0x2cd   :  { %v366_v50 = vsub.f32 %v360_v41, %v365_v49 }
 0x2cf   :  { %v367_v51 = vmul.f32 1.442695, %v366_v50 }
 0x2d1   :  { %452 = vpow2.f32 %v367_v51 }
 0x2de   :  { %v453_v52 = vpop.eup %452 }
 0x2df   :  { %v369_v53 = vsel %vm55_vm1, %v453_v52, 0.0 }
 0x2e0   :  { %370 = vadd.xlane.f32.xlu1 %v369_v53 }
 0x2e1   :  { %487 = shalt.err (!%p484_p9)
}
 0x2e2   :  { %384 = dma.vmem_to_hbm [thread:$0]  %s382_s4, 32, %s629_s7, [#allocation6]  }
 0x2e3   :  { %s528_s26 = smov [#allocation8]  }
 0x2e4   :  { %s391_s27 = sshll.u32 %s528_s26, 4  ;;  %s392_s27 = int_to_ptr.vmem [resolvable:$true] %s391_s27 }
 0x2e5   :  { %s496_s28 = scalar_lea.vmem %s392_s27, 32  ;;  %p501_p11 = scmp.lt.s32.totalorder %s392_s27, %s392_s27 }
 0x2e6   :  { %p497_p10 = scmp.ne.s32.totalorder %s392_s27, %s496_s28  ;;  %p502_p12 = scmp.lt.s32.totalorder %s496_s28, %s496_s28 }
 0x2e8   :  { %p503_p13 = por %p502_p12, %p501_p11 }
 0x2ea   :  { %p504_p0 = pnand %p503_p13, %p497_p10 }
 0x369   :  { %v371_v54 = vpop.xlane.xlu1 %370 }
 0x36a   :  { %454 = vrcp.f32 %v371_v54 }
 0x377   :  { %v455_v55 = vpop.eup %454 }
 0x378   :  { %v373_v56 = vmul.f32 %v455_v55, %v453_v52 }
 0x37a   :  { %374 = vst.msk [vmem:[#allocation8] sm:$0x3] %vm55_vm1, %v373_v56 }
 0x37b   :  { %507 = shalt.err (!%p504_p0)
}
 0x37c   :  { %394 = dma.vmem_to_hbm [thread:$0]  %s392_s27, 32, %s630_s8, [#allocation9]  }
 0x37d   :  { %518 = dma.done.wait [#allocation6], 32  }
 0x37e   :  { %519 = vsyncadd [#allocation6], 4294967264 }
 0x37f   :  { %520 = dma.done.wait [#allocation9], 32  }
 0x380   :  { %521 = vsyncadd [#allocation9], 4294967264 }
 0x381   :  { %401 = vsyncpa [#allocation5], 1 }
 0x382   :  { %402 = vsyncpa [#allocation6], 1 }
 0x383   :  { %403 = vsyncpa [#allocation9], 1 }

</bundles_post_ra>
